<compile_context>
chip_gen: v6e
topology: v6e:2x2x1
jax: 0.10.0
libtpu: 0.0.40
codegen_flags: <defaults>
</compile_context>

<pallas_src>
import functools

import jax
import jax.numpy as jnp
from jax.experimental import pallas as pl
from jax.experimental.pallas import tpu as pltpu


def _ffn_kernel(x_ref, w1_ref, b1_ref, w2_ref, b2_ref, o_ref, acc_ref):
    # x_ref:  (tm, d_model)          bf16
    # w1_ref: (d_model, tff)         bf16     b1_ref: (1, tff)     f32
    # w2_ref: (tff, d_model)         bf16     b2_ref: (1, d_model) f32
    # o_ref:  (tm, d_model)          out dtype
    # acc_ref:(tm, d_model)          f32 accumulator (resident over k axis)
    k = pl.program_id(1)

    @pl.when(k == 0)
    def _():
        acc_ref[...] = jnp.zeros_like(acc_ref)

    # First matmul + bias + ReLU on this d_ff slice (f32 MXU accumulation).
    h = jnp.dot(x_ref[...], w1_ref[...], preferred_element_type=jnp.float32)
    h = jnp.maximum(h + b1_ref[...], 0.0)
    # TODO(synk): training-mode dropout would mask `h` here (pltpu.prng_seed +
    # pltpu.prng_random_bits); eval-mode dropout is identity so it is omitted.

    # Second matmul: partial contribution of this d_ff slice, accumulate in f32.
    acc_ref[...] += jnp.dot(h.astype(w2_ref.dtype), w2_ref[...],
                            preferred_element_type=jnp.float32)

    @pl.when(k == pl.num_programs(1) - 1)
    def _():
        o_ref[...] = (acc_ref[...] + b2_ref[...]).astype(o_ref.dtype)


@functools.partial(jax.jit, static_argnames=("tm", "tff", "compute_dtype"))
def feed_forward(x, w1, b1, w2, b2, *, tm=256, tff=512,
                 compute_dtype=jnp.bfloat16):
    """x: [B, S, d_model] -> [B, S, d_model].

    w1: [d_model, d_ff], b1: [d_ff], w2: [d_ff, d_model], b2: [d_model].
    """
    B, S, d_model = x.shape
    d_ff = w1.shape[1]
    out_dtype = x.dtype
    M = B * S

    # Row tile: large for MXU utilization on real shapes, but never bigger than
    # the (sublane-rounded) number of rows so tiny demo shapes don't over-pad.
    tm = min(tm, ((M + 7) // 8) * 8)
    M_pad = pl.cdiv(M, tm) * tm

    # d_ff tile: multiple of 128 for real shapes; fall back to the full d_ff if
    # it doesn't divide evenly (keeps the kernel runnable for any d_ff).
    tff = min(tff, d_ff)
    if d_ff % tff != 0:
        tff = d_ff

    x2d = x.reshape(M, d_model)
    if M_pad != M:
        x2d = jnp.pad(x2d, ((0, M_pad - M), (0, 0)))

    # bf16 matmul operands (halves HBM/VMEM traffic, hits MXU peak); biases and
    # accumulation stay f32.
    xc = x2d.astype(compute_dtype)
    w1c = w1.astype(compute_dtype)
    w2c = w2.astype(compute_dtype)
    b1f = b1.astype(jnp.float32).reshape(1, d_ff)
    b2f = b2.astype(jnp.float32).reshape(1, d_model)

    bytes_per = jnp.dtype(compute_dtype).itemsize
    cost = pl.CostEstimate(
        flops=4 * M_pad * d_model * d_ff,
        transcendentals=0,
        bytes_accessed=(M_pad * d_model * bytes_per          # x
                        + d_model * d_ff * bytes_per          # W1
                        + d_ff * d_model * bytes_per          # W2
                        + (d_ff + d_model) * 4                # biases
                        + M_pad * d_model * jnp.dtype(out_dtype).itemsize),
    )

    out2d = pl.pallas_call(
        _ffn_kernel,
        out_shape=jax.ShapeDtypeStruct((M_pad, d_model), out_dtype),
        grid_spec=pltpu.PrefetchScalarGridSpec(
            num_scalar_prefetch=0,
            grid=(M_pad // tm, d_ff // tff),          # (rows, d_ff reduction)
            in_specs=[
                pl.BlockSpec((tm, d_model), lambda i, k: (i, 0)),   # x rows
                pl.BlockSpec((d_model, tff), lambda i, k: (0, k)),  # W1 slice
                pl.BlockSpec((1, tff), lambda i, k: (0, k)),        # b1 slice
                pl.BlockSpec((tff, d_model), lambda i, k: (k, 0)),  # W2 slice
                pl.BlockSpec((1, d_model), lambda i, k: (0, 0)),    # b2
            ],
            out_specs=pl.BlockSpec((tm, d_model), lambda i, k: (i, 0)),
            scratch_shapes=[pltpu.VMEM((tm, d_model), jnp.float32)],
        ),
        compiler_params=pltpu.CompilerParams(
            dimension_semantics=("parallel", "arbitrary"),
            vmem_limit_bytes=64 * 1024 * 1024,
        ),
        cost_estimate=cost,
    )(xc, w1c, b1f, w2c, b2f)

    return out2d[:M].reshape(B, S, d_model)


def init_params(key, d_model, d_ff, dtype=jnp.float32):
    """Deterministic synthetic parameters matching nn.Linear init ranges.
    Weights stored transposed as [in, out]; biases as 1-D like PyTorch."""
    k1, k2, k3, k4 = jax.random.split(key, 4)
    lim1 = 1.0 / (d_model ** 0.5)
    lim2 = 1.0 / (d_ff ** 0.5)
    w1 = jax.random.uniform(k1, (d_model, d_ff), dtype, -lim1, lim1)
    b1 = jax.random.uniform(k2, (d_ff,), dtype, -lim1, lim1)
    w2 = jax.random.uniform(k3, (d_ff, d_model), dtype, -lim2, lim2)
    b2 = jax.random.uniform(k4, (d_model,), dtype, -lim2, lim2)
    return w1, b1, w2, b2


if __name__ == "__main__":
    key = jax.random.PRNGKey(0)
    kx, kp = jax.random.split(key)

    # Small shapes consistent with the module: [batch, seq, d_model]
    B, S, d_model, d_ff = 2, 8, 32, 64
    x = jax.random.normal(kx, (B, S, d_model), jnp.float32)
    w1, b1, w2, b2 = init_params(kp, d_model, d_ff)

    out = feed_forward(x, w1, b1, w2, b2)
    out = jax.block_until_ready(out)

    # Pure-JAX f32 reference (dropout = identity in eval mode). The kernel runs
    # its matmuls in bf16 with f32 accumulation, so use a bf16-level tolerance.
    h_ref = jnp.maximum(x @ w1 + b1, 0.0)
    ref = h_ref @ w2 + b2
    assert out.shape == (B, S, d_model)
    max_err = float(jnp.max(jnp.abs(out - ref)))
    assert jnp.allclose(out, ref, atol=3e-2, rtol=3e-2), f"max abs err {max_err}"

    print("KERNEL_OK")
</pallas_src>

<mosaic_0001>
module attributes {stable_mosaic.version = 11 : i64} {
  func.func @_ffn_kernel(%arg0: i32, %arg1: i32, %arg2: memref<16x32xbf16, #tpu.memory_space<vmem>>, %arg3: memref<32x64xbf16, #tpu.memory_space<vmem>>, %arg4: memref<1x64xf32, #tpu.memory_space<vmem>>, %arg5: memref<64x32xbf16, #tpu.memory_space<vmem>>, %arg6: memref<1x32xf32, #tpu.memory_space<vmem>>, %arg7: memref<16x32xf32, #tpu.memory_space<vmem>>, %arg8: memref<16x32xf32, #tpu.memory_space<vmem>>) attributes {dimension_semantics = [#tpu.dimension_semantics<parallel>, #tpu.dimension_semantics<arbitrary>], iteration_bounds = array<i64: 1, 1>, scalar_prefetch = 0 : i64, scratch_operands = 1 : i64, tpu.core_type = #tpu.core_type<tc>, window_params = [{transform_indices = @transform_0, window_bounds = array<i64: 16, 32>}, {transform_indices = @transform_1, window_bounds = array<i64: 32, 64>}, {transform_indices = @transform_2, window_bounds = array<i64: 1, 64>}, {transform_indices = @transform_3, window_bounds = array<i64: 64, 32>}, {pipeline_mode = #tpu.pipeline_mode<synchronous>, transform_indices = @transform_4, window_bounds = array<i64: 1, 32>}, {transform_indices = @transform_5, window_bounds = array<i64: 16, 32>}]} {
    %c0_i32 = arith.constant 0 : i32
    %0 = arith.cmpi eq, %arg1, %c0_i32 : i32
    %1 = arith.extui %0 : i1 to i32
    %c0_i32_0 = arith.constant 0 : i32
    %2 = arith.cmpi ne, %1, %c0_i32_0 : i32
    scf.if %2 {
      %cst_16 = arith.constant 0.000000e+00 : f32
      %20 = vector.broadcast %cst_16 : f32 to vector<16x32xf32>
      %c0_17 = arith.constant 0 : index
      %c0_18 = arith.constant 0 : index
      %21 = vector.load %arg8[%c0_17, %c0_18] : memref<16x32xf32, #tpu.memory_space<vmem>>, vector<16x32xf32>
      tpu.vector_store %arg8[%c0_17, %c0_18], %20 {strides = array<i32>} : memref<16x32xf32, #tpu.memory_space<vmem>>, vector<16x32xf32>,
    } else {
    }
    %c0 = arith.constant 0 : index
    %c0_1 = arith.constant 0 : index
    %3 = vector.load %arg2[%c0, %c0_1] : memref<16x32xbf16, #tpu.memory_space<vmem>>, vector<16x32xbf16>
    %c0_2 = arith.constant 0 : index
    %c0_3 = arith.constant 0 : index
    %4 = vector.load %arg3[%c0_2, %c0_3] : memref<32x64xbf16, #tpu.memory_space<vmem>>, vector<32x64xbf16>
    %cst = arith.constant dense<0.000000e+00> : vector<16x64xf32>
    %5 = tpu.matmul %3, %4, %cst {dimension_numbers = #tpu.dot_dimension_numbers<[1], [0], [0], [1], [0, 0, 1, 1], [], []>} : vector<16x32xbf16>, vector<32x64xbf16>, vector<16x64xf32> -> vector<16x64xf32>
    %c0_4 = arith.constant 0 : index
    %c0_5 = arith.constant 0 : index
    %6 = vector.load %arg4[%c0_4, %c0_5] : memref<1x64xf32, #tpu.memory_space<vmem>>, vector<1x64xf32>
    %7 = vector.broadcast %6 : vector<1x64xf32> to vector<16x64xf32>
    %8 = arith.addf %5, %7 : vector<16x64xf32>
    %cst_6 = arith.constant 0.000000e+00 : f32
    %9 = vector.broadcast %cst_6 : f32 to vector<16x64xf32>
    %10 = arith.maximumf %8, %9 : vector<16x64xf32>
    %c0_7 = arith.constant 0 : index
    %c0_8 = arith.constant 0 : index
    %11 = vector.load %arg8[%c0_7, %c0_8] : memref<16x32xf32, #tpu.memory_space<vmem>>, vector<16x32xf32>
    %12 = arith.truncf %10 : vector<16x64xf32> to vector<16x64xbf16>
    %c0_9 = arith.constant 0 : index
    %c0_10 = arith.constant 0 : index
    %13 = vector.load %arg5[%c0_9, %c0_10] : memref<64x32xbf16, #tpu.memory_space<vmem>>, vector<64x32xbf16>
    %cst_11 = arith.constant dense<0.000000e+00> : vector<16x32xf32>
    %14 = tpu.matmul %12, %13, %cst_11 {dimension_numbers = #tpu.dot_dimension_numbers<[1], [0], [0], [1], [0, 0, 1, 1], [], []>} : vector<16x64xbf16>, vector<64x32xbf16>, vector<16x32xf32> -> vector<16x32xf32>
    %15 = arith.addf %11, %14 : vector<16x32xf32>
    %c0_12 = arith.constant 0 : index
    %c0_13 = arith.constant 0 : index
    %16 = vector.load %arg8[%c0_12, %c0_13] : memref<16x32xf32, #tpu.memory_space<vmem>>, vector<16x32xf32>
    tpu.vector_store %arg8[%c0_12, %c0_13], %15 {strides = array<i32>} : memref<16x32xf32, #tpu.memory_space<vmem>>, vector<16x32xf32>,
    %c0_i32_14 = arith.constant 0 : i32
    %17 = arith.cmpi eq, %arg1, %c0_i32_14 : i32
    %18 = arith.extui %17 : i1 to i32
    %c0_i32_15 = arith.constant 0 : i32
    %19 = arith.cmpi ne, %18, %c0_i32_15 : i32
    scf.if %19 {
      %c0_16 = arith.constant 0 : index
      %c0_17 = arith.constant 0 : index
      %20 = vector.load %arg8[%c0_16, %c0_17] : memref<16x32xf32, #tpu.memory_space<vmem>>, vector<16x32xf32>
      %c0_18 = arith.constant 0 : index
      %c0_19 = arith.constant 0 : index
      %21 = vector.load %arg6[%c0_18, %c0_19] : memref<1x32xf32, #tpu.memory_space<vmem>>, vector<1x32xf32>
      %22 = vector.broadcast %21 : vector<1x32xf32> to vector<16x32xf32>
      %23 = arith.addf %20, %22 : vector<16x32xf32>
      %c0_20 = arith.constant 0 : index
      %c0_21 = arith.constant 0 : index
      %24 = vector.load %arg7[%c0_20, %c0_21] : memref<16x32xf32, #tpu.memory_space<vmem>>, vector<16x32xf32>
      tpu.vector_store %arg7[%c0_20, %c0_21], %23 {strides = array<i32>} : memref<16x32xf32, #tpu.memory_space<vmem>>, vector<16x32xf32>,
    } else {
    }
    return
  }
  func.func @transform_0(%arg0: i32, %arg1: i32) -> (i32, i32) {
    %c0_i32 = arith.constant 0 : i32
    %c0_i32_0 = arith.constant 0 : i32
    return %arg0, %c0_i32 : i32, i32
  }
  func.func @transform_1(%arg0: i32, %arg1: i32) -> (i32, i32) {
    %c0_i32 = arith.constant 0 : i32
    %c0_i32_0 = arith.constant 0 : i32
    return %c0_i32, %arg1 : i32, i32
  }
  func.func @transform_2(%arg0: i32, %arg1: i32) -> (i32, i32) {
    %c0_i32 = arith.constant 0 : i32
    %c0_i32_0 = arith.constant 0 : i32
    return %c0_i32, %arg1 : i32, i32
  }
  func.func @transform_3(%arg0: i32, %arg1: i32) -> (i32, i32) {
    %c0_i32 = arith.constant 0 : i32
    %c0_i32_0 = arith.constant 0 : i32
    return %arg1, %c0_i32 : i32, i32
  }
  func.func @transform_4(%arg0: i32, %arg1: i32) -> (i32, i32) {
    %c0_i32 = arith.constant 0 : i32
    %c0_i32_0 = arith.constant 0 : i32
    %c0_i32_1 = arith.constant 0 : i32
    return %c0_i32, %c0_i32_0 : i32, i32
  }
  func.func @transform_5(%arg0: i32, %arg1: i32) -> (i32, i32) {
    %c0_i32 = arith.constant 0 : i32
    %c0_i32_0 = arith.constant 0 : i32
    return %arg0, %c0_i32 : i32, i32
  }
}

</mosaic_0001>

<bundles_post_ra>
// kernel: feed_forward.1
= control target key start
LH: loop header
LB: loop body
LE: loop exit
PB: predicated region body
PF: predicated region fallthrough
CT: control target
= control target key end

     0   :  { %v295_v1 = vmov 0.0   ;;  %vm296_vm0 = vmmov 0   ;;  %vm26_vm1 = vcmask 261120   ;;  %s367_s0 = inlined_call_operand.vmem [shape: bf16[16,32], index: 0, kind: input, shape index: {}]   ;;  %s368_s1 = inlined_call_operand.vmem [shape: bf16[32,64], index: 1, kind: input, shape index: {}]   ;;  %s369_s2 = inlined_call_operand.vmem [shape: f32[1,64], index: 2, kind: input, shape index: {}]   ;;  %s370_s3 = inlined_call_operand.vmem [shape: bf16[64,32], index: 3, kind: input, shape index: {}]   ;;  %s371_s4 = inlined_call_operand.vmem [shape: f32[1,32], index: 4, kind: input, shape index: {}]   ;;  %s372_s5 = inlined_call_operand.hbm [shape: f32[16,32], index: 5, kind: output, shape index: {}]  }
   0x1   :  { %v266_v0 = vld [vmem:[%s368_s1 + $0x8] sm:$0xff]   ;;  %241 = vmatprep.subr.bf16.mxu0 %v295_v1  ;;  %249 = vmatprep.subr.bf16.mxu1 %v295_v1  ;;  %v267_v2 = vld [vmem:[%s368_s1] sm:$0xff]   ;;  %27 = vst.msk [vmem:[#allocation2] sm:$0xff] %vm26_vm1, %v295_v1  ;;  %28 = vst.msk [vmem:[#allocation2 + $0x8] sm:$0xff] %vm26_vm1, %v295_v1 }
   0x2   :  { %242 = vmatpush3.bf16.msra.mxu0 %v266_v0  ;;  %245 = vmatprep.mubr.msk.bf16.mxu0 %vm296_vm0, %v295_v1  ;;  %v269_v3 = vld [vmem:[%s370_s3 + $0x18] sm:$0xff]   ;;  %v268_v4 = vld [vmem:[%s367_s0] sm:$0xff]  }
   0x3   :  { %243 = vmatprep.subr.bf16.mxu0 %v295_v1  ;;  %257 = vmatprep.mubr.msk.bf16.mxu1 %vm296_vm0, %v295_v1 }
   0x4   :  { %250 = vmatpush3.bf16.msra.mxu1 %v269_v3 }
   0x5   :  { %251 = vmatprep.subr.bf16.mxu1 %v295_v1 }
   0x6   :  { %244 = vmatpush3.bf16.msra.mxu0 %v267_v2 }
   0x7   :  { %10 = vsyncpa [#allocation4], 0  ;;  %v270_v5 = vld [vmem:[%s370_s3 + $0x10] sm:$0xff]   ;;  %v271_v6 = vld [vmem:[%s370_s3 + $0x8] sm:$0xff]   ;;  %vm141_vm2 = vcmask 523264   ;;  %s297_s7 = smov [#allocation3]  }
   0x8   :  { %252 = vmatpush3.bf16.msra.mxu1 %v270_v5  ;;  %v272_v7 = vld [vmem:[%s370_s3] sm:$0xff]   ;;  %v107_v22 = vld [vmem:[#allocation2 + $0x8] sm:$0xff]  ;;  %s211_s8 = sshll.u32 %s297_s7, 4  ;;  %s212_s8 = int_to_ptr.vmem [resolvable:$true] %s211_s8 }
   0x9   :  { %246 = vmatmul.mubr.msk.bf16.vlgmr.msra.gmra.mxu0 %vm26_vm1, %v268_v4  ;;  %253 = vmatprep.subr.bf16.mxu1 %v295_v1  ;;  %v222_v8 = vld [vmem:[%s369_s2] ss:$0 sm:$0xff]  ;;  %s273_s9 = scalar_lea.vmem %s212_s8, 256  ;;  %p278_p1 = scmp.lt.s32.totalorder %s212_s8, %s212_s8 }
   0xa   :  { %v106_v18 = vld [vmem:[#allocation2] sm:$0xff]  ;;  %p274_p0 = scmp.ne.s32.totalorder %s212_s8, %s273_s9  ;;  %p279_p2 = scmp.lt.s32.totalorder %s273_s9, %s273_s9 }
   0xb   :  { %v232_v26 = vld [vmem:[%s371_s4] ss:$0 sm:$0xff] }
   0xc   :  { %254 = vmatpush3.bf16.msra.mxu1 %v271_v6  ;;  %p280_p3 = por %p279_p2, %p278_p1 }
   0xd   :  { %255 = vmatprep.subr.bf16.mxu1 %v295_v1 }
   0xe   :  { %p281_p4 = pnand %p280_p3, %p274_p0 }
  0x10   :  { %256 = vmatpush3.bf16.msra.mxu1 %v272_v7 }
  0xc9   :  { %v97_v9 = vpop.f32.mrf.mxu0 }
  0xca   :  { %v98_v11 = vadd.f32 %v222_v8, %v97_v9 }
  0xcb   :  { %v247_v10 = vpop.f32.mrf.mxu0 }
  0xcc   :  { %v104_v15 = vmax.f32 %v98_v11, 0.0 }
  0xcd   :  { %v100_v12 = vpop.f32.mrf.mxu0 }
  0xce   :  { %v101_v13 = vadd.f32 %v222_v8, %v100_v12 }
  0xcf   :  { %v248_v14 = vpop.f32.mrf.mxu0 }
  0xd0   :  { %v105_v16 = vmax.f32 %v101_v13, 0.0 }
  0xd2   :  { %v108_v17 = vpack.c.bf16 %v105_v16, %v104_v15 }
  0xd4   :  { %258 = vmatmul.mubr.msk.bf16.vlgmr.msra.gmra.mxu1 %vm141_vm2, %v108_v17 }
 0x194   :  { %v179_v19 = vpop.f32.mrf.mxu1 }
 0x195   :  { %v186_v20 = vadd.f32 %v179_v19, %v106_v18 }
 0x196   :  { %v259_v21 = vpop.f32.mrf.mxu1 }
 0x197   :  { %188 = vst.msk [vmem:[#allocation2] sm:$0xff] %vm26_vm1, %v186_v20 }
 0x198   :  { %v182_v23 = vpop.f32.mrf.mxu1 }
 0x199   :  { %v187_v24 = vadd.f32 %v182_v23, %v107_v22 }
 0x19a   :  { %v260_v25 = vpop.f32.mrf.mxu1 }
 0x19b   :  { %189 = vst.msk [vmem:[#allocation2 + $0x8] sm:$0xff] %vm26_vm1, %v187_v24 }
 0x19e   :  { %v193_v27 = vld [vmem:[#allocation2] sm:$0xff] }
 0x19f   :  { %v202_v28 = vadd.f32 %v232_v26, %v193_v27 }
 0x1a1   :  { %204 = vst.msk [vmem:[#allocation3] sm:$0xff] %vm26_vm1, %v202_v28 }
 0x1a2   :  { %v194_v29 = vld [vmem:[#allocation2 + $0x8] sm:$0xff] }
 0x1a3   :  { %v203_v30 = vadd.f32 %v232_v26, %v194_v29 }
 0x1a5   :  { %205 = vst.msk [vmem:[#allocation3 + $0x8] sm:$0xff] %vm26_vm1, %v203_v30 }
 0x1a6   :  { %284 = shalt.err (!%p281_p4)
}
 0x1a7   :  { %s298_s10 = smov 128   ;;  %s299_s4 = smov 8  }
 0x1a8   :  { %217 = dma.vmem_to_hbm [thread:$0]  %s212_s8, 256, %s372_s5, [#allocation4], %s298_s10, %s298_s10, %s299_s4  }
 0x1a9   :  { %293 = dma.done.wait [#allocation4], 256  }
 0x1aa   :  { %294 = vsyncadd [#allocation4], 4294967040 }
 0x1ab   :  { %221 = vsyncpa [#allocation4], 1 }

</bundles_post_ra>
